<compile_context>
chip_gen: v7x
topology: tpu7x:2x2x1
jax: 0.10.0
libtpu: 0.0.40
codegen_flags: <defaults>
</compile_context>

<pallas_src>
import functools

import jax
import jax.numpy as jnp
from jax import lax
from jax.experimental import pallas as pl
from jax.experimental.pallas import tpu as pltpu


def _round_up(a, b):
    return -(-a // b) * b


def _tv_block_kernel(x_ref, out_h_ref, out_w_ref, *, sp, n_slabs, tb, bc,
                     needs_mask):
    """Reduce one (tb, H, W) block of planes to TV partial sums.

    The block is processed in `n_slabs` slabs of `sp` planes so the f32
    widen + shifted-diff temporaries stay slab-sized, not block-sized.
    """
    _, h, w = x_ref.shape
    has_h = h > 1
    has_w = w > 1
    block_start = pl.program_id(0) * tb  # global index of the block's 1st plane

    def slab_partials(start):
        # Native-dtype load of one slab, widened to f32 right before the diffs.
        slab = x_ref[pl.ds(start, sp), :, :].astype(jnp.float32)
        if needs_mask:
            # Last (padded) block: zero planes past the end of the array so the
            # DMA-padding garbage contributes nothing to the sums.
            if sp == 1:
                valid = (block_start + start) < bc
                slab = jnp.where(valid, slab, 0.0)
            else:
                plane_idx = (block_start + start
                             + lax.broadcasted_iota(jnp.int32, (sp, 1, 1), 0))
                slab = jnp.where(plane_idx < bc, slab, 0.0)
        parts = []
        if has_h:
            dh = slab[:, 1:, :] - slab[:, :-1, :]
            # Reduce the batch axis (plain VPU adds) then the sublane axis; the
            # lane axis stays as a (1, w) partial so the cross-lane reduce
            # happens once per block, not per slab.
            parts.append(jnp.sum(jnp.sum(dh * dh, axis=0), axis=0, keepdims=True))
        if has_w:
            dw = slab[:, :, 1:] - slab[:, :, :-1]
            parts.append(jnp.sum(jnp.sum(dw * dw, axis=0), axis=0, keepdims=True))
        return tuple(parts)

    if n_slabs == 1:
        carry = slab_partials(0)
    else:
        shapes = []
        if has_h:
            shapes.append((1, w))
        if has_w:
            shapes.append((1, w - 1))
        init = tuple(jnp.zeros(s, jnp.float32) for s in shapes)

        def body(s, carry):
            start = pl.multiple_of(s * sp, sp)
            return tuple(c + p for c, p in zip(carry, slab_partials(start)))

        carry = lax.fori_loop(0, n_slabs, body, init,
                              unroll=min(8, n_slabs))

    idx = 0
    if has_h:
        h_sum = jnp.sum(carry[idx])
        idx += 1
    else:
        h_sum = jnp.float32(0.0)
    if has_w:
        w_sum = jnp.sum(carry[idx])
        idx += 1
    else:
        w_sum = jnp.float32(0.0)

    # Lane-dense (1, 1, 128) stores -> unmasked vst; wrapper reads lane 0.
    out_h_ref[...] = jnp.full((1, 1, 128), h_sum, dtype=jnp.float32)
    out_w_ref[...] = jnp.full((1, 1, 128), w_sum, dtype=jnp.float32)


def _default_vmem_limit_bytes():
    """Generation-aware scoped-VMEM limit: ~48 MiB on v7x, 64 MiB on v5e/v6e."""
    try:
        cap = int(pltpu.get_tpu_info().vmem_capacity_bytes)
    except Exception:
        cap = 64 * 1024 * 1024
    # Leave ~25% headroom for compiler scratch; cap at 64 MiB.
    return int(min(max(cap - cap // 4, 16 * 1024 * 1024), 64 * 1024 * 1024))


def tv_loss(x, tvloss_weight=1.0, *, target_block_bytes=None,
            slab_bytes=256 * 1024, min_grid_blocks=4):
    """TV loss identical to the PyTorch TVLoss.forward.

    x: (B, C, H, W) array (NCHW). Returns a float32 scalar.
    """
    b, c, h, w = x.shape
    bc = b * c

    count_h = max(bc * (h - 1) * w, 1)
    count_w = max(bc * h * (w - 1), 1)

    if bc == 0 or (h <= 1 and w <= 1):
        return jnp.float32(tvloss_weight) * jnp.float32(0.0)

    x_flat = x.reshape(bc, h, w)  # no-copy reshape, keeps native dtype

    # (8,128)-tile-padded per-plane footprints (what actually occupies VMEM).
    pad_h = _round_up(h, 8)
    pad_w = _round_up(w, 128)
    plane_in_bytes = pad_h * pad_w * x.dtype.itemsize
    plane_f32_bytes = pad_h * pad_w * 4

    # Slab = inner-loop unit; all f32 temporaries are O(slab), not O(block).
    sp = max(1, min(bc, slab_bytes // plane_f32_bytes))
    slab_f32_bytes = sp * plane_f32_bytes

    vmem_limit = _default_vmem_limit_bytes()
    if target_block_bytes is None:
        # Peak ~= 2 double-buffered input blocks + ~6 slab-sized f32 temps.
        target_block_bytes = min(
            16 * 1024 * 1024,
            max(plane_in_bytes,
                (vmem_limit - 6 * slab_f32_bytes - 2 * 1024 * 1024) // 2),
        )

    # Block = DMA unit = sp * n_slabs planes of input-dtype data.
    n_slabs = max(1, target_block_bytes // max(1, sp * plane_in_bytes))
    n_slabs = min(n_slabs, max(1, bc // sp))  # block leading dim <= array
    if min_grid_blocks > 1:
        # Keep >= min_grid_blocks grid steps when possible so the "parallel"
        # grid shards across both v7x TensorCores (negligible cost on 1-TC
        # v5e/v6e: a couple of extra ~0.35us steps).
        n_slabs = min(n_slabs, max(1, (-(-bc // min_grid_blocks)) // sp))

    tb = sp * n_slabs
    nb = -(-bc // tb)               # cdiv: ragged tail handled in-kernel
    needs_mask = (bc % tb) != 0

    kernel = functools.partial(_tv_block_kernel, sp=sp, n_slabs=n_slabs,
                               tb=tb, bc=bc, needs_mask=needs_mask)

    out_h, out_w = pl.pallas_call(
        kernel,
        out_shape=(
            jax.ShapeDtypeStruct((nb, 1, 128), jnp.float32),
            jax.ShapeDtypeStruct((nb, 1, 128), jnp.float32),
        ),
        grid_spec=pltpu.PrefetchScalarGridSpec(
            num_scalar_prefetch=0,
            grid=(nb,),
            in_specs=[pl.BlockSpec((tb, h, w), lambda i: (i, 0, 0))],
            out_specs=(
                pl.BlockSpec((1, 1, 128), lambda i: (i, 0, 0)),
                pl.BlockSpec((1, 1, 128), lambda i: (i, 0, 0)),
            ),
        ),
        compiler_params=pltpu.CompilerParams(
            dimension_semantics=("parallel",),
            vmem_limit_bytes=vmem_limit,
        ),
    )(x_flat)

    h_tv = jnp.sum(out_h[:, 0, 0])
    w_tv = jnp.sum(out_w[:, 0, 0])
    return jnp.float32(tvloss_weight) * (h_tv / count_h + w_tv / count_w)


def tv_loss_ref(x, tvloss_weight=1.0):
    # Pure-JAX reference matching the PyTorch TVLoss.forward spec.
    b, c, h, w = x.shape
    xf = x.astype(jnp.float32)
    h_tv = jnp.sum((xf[:, :, 1:, :] - xf[:, :, :-1, :]) ** 2)
    w_tv = jnp.sum((xf[:, :, :, 1:] - xf[:, :, :, :-1]) ** 2)
    count_h = max(b * c * (h - 1) * w, 1)
    count_w = max(b * c * h * (w - 1), 1)
    return tvloss_weight * (h_tv / count_h + w_tv / count_w)


if __name__ == "__main__":
    key = jax.random.PRNGKey(0)
    x = jax.random.normal(key, (2, 4, 16, 16), dtype=jnp.float32)
    ref = tv_loss_ref(x, tvloss_weight=1.0)

    plane = 16 * 128 * 4  # padded f32 plane footprint for these tests

    # 1) Default sizing: whole tensor in one block, single slab.
    out = jax.block_until_ready(tv_loss(x, tvloss_weight=1.0))
    assert jnp.allclose(out, ref, rtol=1e-5, atol=1e-5), (out, ref)

    # 2) Force a multi-block parallel grid (tb=2 planes -> nb=4) and the
    #    in-kernel slab loop, no remainder.
    out2 = jax.block_until_ready(
        tv_loss(x, tvloss_weight=1.0,
                target_block_bytes=3 * plane, slab_bytes=plane))
    assert jnp.allclose(out2, ref, rtol=1e-5, atol=1e-5), (out2, ref)

    # 3) Ragged tail covered by the same pallas_call (bc=6, tb=4 -> masked
    #    last block with 2 padded planes), no wrapper-side slice/copy.
    x3 = jax.random.normal(jax.random.PRNGKey(1), (3, 2, 16, 16),
                           dtype=jnp.float32)
    ref3 = tv_loss_ref(x3, tvloss_weight=0.5)
    out3 = jax.block_until_ready(
        tv_loss(x3, tvloss_weight=0.5,
                target_block_bytes=4 * plane, slab_bytes=2 * plane,
                min_grid_blocks=1))
    assert jnp.allclose(out3, ref3, rtol=1e-5, atol=1e-5), (out3, ref3)

    # 4) bf16 input: streamed in native dtype, widened to f32 per slab.
    xb = x.astype(jnp.bfloat16)
    refb = tv_loss_ref(xb, tvloss_weight=1.0)
    outb = jax.block_until_ready(tv_loss(xb, tvloss_weight=1.0))
    assert jnp.allclose(outb, refb, rtol=1e-5, atol=1e-5), (outb, refb)

    print("KERNEL_OK")
</pallas_src>

<mosaic_0001>
module attributes {stable_mosaic.version = 11 : i64} {
  func.func @_tv_block_kernel(%arg0: i32, %arg1: memref<8x16x16xf32, #tpu.memory_space<vmem>>, %arg2: memref<1x1x128xf32, #tpu.memory_space<vmem>>, %arg3: memref<1x1x128xf32, #tpu.memory_space<vmem>>) attributes {dimension_semantics = [#tpu.dimension_semantics<parallel>], iteration_bounds = array<i64: 1>, scalar_prefetch = 0 : i64, scratch_operands = 0 : i64, tpu.core_type = #tpu.core_type<tc>, window_params = [{transform_indices = @transform_0, window_bounds = array<i64: 8, 16, 16>}, {transform_indices = @transform_1, window_bounds = array<i64: 1, 1, 128>}, {transform_indices = @transform_2, window_bounds = array<i64: 1, 1, 128>}]} {
    %c0 = arith.constant 0 : index
    %c0_0 = arith.constant 0 : index
    %c0_1 = arith.constant 0 : index
    %0 = vector.load %arg1[%c0, %c0_0, %c0_1] : memref<8x16x16xf32, #tpu.memory_space<vmem>>, vector<8x16x16xf32>
    %1 = vector.extract_strided_slice %0 {offsets = [0, 1, 0], sizes = [8, 15, 16], strides = [1, 1, 1]} : vector<8x16x16xf32> to vector<8x15x16xf32>
    %2 = vector.extract_strided_slice %0 {offsets = [0, 0, 0], sizes = [8, 15, 16], strides = [1, 1, 1]} : vector<8x16x16xf32> to vector<8x15x16xf32>
    %3 = arith.subf %1, %2 : vector<8x15x16xf32>
    %4 = arith.mulf %3, %3 : vector<8x15x16xf32>
    %cst = arith.constant dense<0.000000e+00> : vector<15x16xf32>
    %5 = vector.multi_reduction <add>, %4, %cst [0] : vector<8x15x16xf32> to vector<15x16xf32>
    %cst_2 = arith.constant dense<0.000000e+00> : vector<16xf32>
    %6 = vector.multi_reduction <add>, %5, %cst_2 [0] : vector<15x16xf32> to vector<16xf32>
    %7 = vector.shape_cast %6 : vector<16xf32> to vector<1x16xf32>
    %8 = vector.extract_strided_slice %0 {offsets = [0, 0, 1], sizes = [8, 16, 15], strides = [1, 1, 1]} : vector<8x16x16xf32> to vector<8x16x15xf32>
    %9 = vector.extract_strided_slice %0 {offsets = [0, 0, 0], sizes = [8, 16, 15], strides = [1, 1, 1]} : vector<8x16x16xf32> to vector<8x16x15xf32>
    %10 = arith.subf %8, %9 : vector<8x16x15xf32>
    %11 = arith.mulf %10, %10 : vector<8x16x15xf32>
    %cst_3 = arith.constant dense<0.000000e+00> : vector<16x15xf32>
    %12 = vector.multi_reduction <add>, %11, %cst_3 [0] : vector<8x16x15xf32> to vector<16x15xf32>
    %cst_4 = arith.constant dense<0.000000e+00> : vector<15xf32>
    %13 = vector.multi_reduction <add>, %12, %cst_4 [0] : vector<16x15xf32> to vector<15xf32>
    %14 = vector.shape_cast %13 : vector<15xf32> to vector<1x15xf32>
    %15 = vector.shape_cast %7 : vector<1x16xf32> to vector<1x1x16xf32>
    %cst_5 = arith.constant dense<0.000000e+00> : vector<1xf32>
    %16 = vector.multi_reduction <add>, %15, %cst_5 [1, 2] : vector<1x1x16xf32> to vector<1xf32>
    %17 = vector.shape_cast %16 : vector<1xf32> to vector<1x1x1xf32>
    %18 = vector.extract %17[0, 0, 0] : f32 from vector<1x1x1xf32>
    %19 = vector.shape_cast %14 : vector<1x15xf32> to vector<1x1x15xf32>
    %cst_6 = arith.constant dense<0.000000e+00> : vector<1xf32>
    %20 = vector.multi_reduction <add>, %19, %cst_6 [1, 2] : vector<1x1x15xf32> to vector<1xf32>
    %21 = vector.shape_cast %20 : vector<1xf32> to vector<1x1x1xf32>
    %22 = vector.extract %21[0, 0, 0] : f32 from vector<1x1x1xf32>
    %23 = vector.broadcast %18 : f32 to vector<1x1x128xf32>
    %c0_7 = arith.constant 0 : index
    %c0_8 = arith.constant 0 : index
    %c0_9 = arith.constant 0 : index
    %24 = vector.load %arg2[%c0_7, %c0_8, %c0_9] : memref<1x1x128xf32, #tpu.memory_space<vmem>>, vector<1x1x128xf32>
    tpu.vector_store %arg2[%c0_7, %c0_8, %c0_9], %23 {strides = array<i32>} : memref<1x1x128xf32, #tpu.memory_space<vmem>>, vector<1x1x128xf32>,
    %25 = vector.broadcast %22 : f32 to vector<1x1x128xf32>
    %c0_10 = arith.constant 0 : index
    %c0_11 = arith.constant 0 : index
    %c0_12 = arith.constant 0 : index
    %26 = vector.load %arg3[%c0_10, %c0_11, %c0_12] : memref<1x1x128xf32, #tpu.memory_space<vmem>>, vector<1x1x128xf32>
    tpu.vector_store %arg3[%c0_10, %c0_11, %c0_12], %25 {strides = array<i32>} : memref<1x1x128xf32, #tpu.memory_space<vmem>>, vector<1x1x128xf32>,
    return
  }
  func.func @transform_0(%arg0: i32) -> (i32, i32, i32) {
    %c0_i32 = arith.constant 0 : i32
    %c0_i32_0 = arith.constant 0 : i32
    %c0_i32_1 = arith.constant 0 : i32
    return %arg0, %c0_i32, %c0_i32_0 : i32, i32, i32
  }
  func.func @transform_1(%arg0: i32) -> (i32, i32, i32) {
    %c0_i32 = arith.constant 0 : i32
    %c0_i32_0 = arith.constant 0 : i32
    %c0_i32_1 = arith.constant 0 : i32
    return %arg0, %c0_i32, %c0_i32_0 : i32, i32, i32
  }
  func.func @transform_2(%arg0: i32) -> (i32, i32, i32) {
    %c0_i32 = arith.constant 0 : i32
    %c0_i32_0 = arith.constant 0 : i32
    %c0_i32_1 = arith.constant 0 : i32
    return %arg0, %c0_i32, %c0_i32_0 : i32, i32, i32
  }
}

</mosaic_0001>

<bundles_post_ra>
// kernel: tpu_custom_call.1
= control target key start
LH: loop header
LB: loop body
LE: loop exit
PB: predicated region body
PF: predicated region fallthrough
CT: control target
= control target key end

     0   :  { %8 = vsyncpa [#allocation3], 0  ;;  %s656_s0 = inlined_call_operand.hbm [shape: f32[8,16,16], index: 0, kind: input, shape index: {}]   ;;  %s657_s1 = inlined_call_operand.hbm [shape: f32[1,1,128], index: 1, kind: output, shape index: {0}]   ;;  %s658_s2 = inlined_call_operand.hbm [shape: f32[1,1,128], index: 2, kind: output, shape index: {1}]  }
   0x1   :  { %9 = vsyncpa [#allocation4], 0 }
   0x2   :  { %10 = vsyncpa [#allocation7], 0  ;;  %s443_s9 = smov [#allocation2]   ;;  %s371_s13 = scalar_lea.hbm %s656_s0, 2048 }
   0x3   :  { %s16_s10 = sshll.u32 %s443_s9, 4  ;;  %p372_p0 = scmp.ne.s32.totalorder %s656_s0, %s371_s13  ;;  %s17_s10 = int_to_ptr.vmem [resolvable:$true] %s16_s10 }
   0x4   :  { %p375_p1 = scmp.lt.u32.totalorder %s371_s13, %s656_s0 }
   0x6   :  { %p377_p2 = pnand %p375_p1, %p372_p0 }
   0x8   :  { %380 = shalt.err (!%p377_p2)
}
   0x9   :  { %s381_s18 = scalar_lea.vmem %s17_s10, 2048  ;;  %p386_p4 = scmp.lt.s32.totalorder %s17_s10, %s17_s10 }
   0xa   :  { %p382_p3 = scmp.ne.s32.totalorder %s17_s10, %s381_s18  ;;  %p387_p5 = scmp.lt.s32.totalorder %s381_s18, %s381_s18 }
   0xc   :  { %p388_p6 = por %p387_p5, %p386_p4 }
   0xe   :  { %p389_p7 = pnand %p388_p6, %p382_p3 }
  0x10   :  { %392 = shalt.err (!%p389_p7)
}
  0x11   :  { %s444_s19 = smov 128   ;;  %s445_s20 = smov 8  }
  0x12   :  { %22 = dma.hbm_to_vmem [thread:$0]  %s656_s0, 2048, %s17_s10, [#allocation3], %s444_s19, %s444_s19, %s445_s20  }
  0x13   :  { %437 = dma.done.wait [#allocation3], 2048  }
  0x14   :  { %438 = vsyncadd [#allocation3], 4294965248  ;;  %v477_v0 = vld [vmem:[#allocation2 + $0x10] sm:$0xff]  ;;  %v479_v1 = vld [vmem:[#allocation2] sm:$0xff]  ;;  %s446_s23 = smov 1   ;;  %vm58_vm0 = vcmask 1040384  }
  0x15   :  { %185 = vrot.lane.b32.xlu1 %v477_v0, %s446_s23  ;;  %v62_v2 = vrot.slane %v477_v0, 7  ;;  %181 = vrot.lane.b32.xlu0 %v479_v1, %s446_s23  ;;  %v59_v3 = vrot.slane %v479_v1, 7  ;;  %v487_v4 = vld [vmem:[#allocation2 + $0x18] sm:$0xff]  ;;  %v489_v5 = vld [vmem:[#allocation2 + $0x20] sm:$0xff]  ;;  %v492_v7 = vld [vmem:[#allocation2 + $0x8] sm:$0xff]  ;;  %vm131_vm1 = vcmask 130049  }
  0x16   :  { %v63_v6 = vrot.slane %v487_v4, 7  ;;  %v65_v8 = vrot.slane %v489_v5, 7  ;;  %v60_v11 = vrot.slane %v492_v7, 7  ;;  %v502_v12 = vld [vmem:[#allocation2 + $0x28] sm:$0xff]  ;;  %v507_v16 = vld [vmem:[#allocation2 + $0x30] sm:$0xff]  ;;  %v516_v22 = vld [vmem:[#allocation2 + $0x38] sm:$0xff] }
  0x17   :  { %v101_v9 = vsub.f32 %v477_v0, %v62_v2  ;;  %v99_v10 = vsub.f32 %v479_v1, %v59_v3  ;;  %v66_v14 = vrot.slane %v502_v12, 7  ;;  %v68_v20 = vrot.slane %v507_v16, 7  ;;  %v521_v27 = vld [vmem:[#allocation2 + $0x40] sm:$0xff]  ;;  %v532_v34 = vld [vmem:[#allocation2 + $0x48] sm:$0xff]  ;;  %v536_v39 = vld [vmem:[#allocation2 + $0x50] sm:$0xff]  ;;  %s447_s0 = smov 127  }
  0x18   :  { %v64_v13 = vsel %vm58_vm0, %v62_v2, %v63_v6  ;;  %v103_v15 = vsub.f32 %v489_v5, %v65_v8  ;;  %v61_v19 = vsel %vm58_vm0, %v59_v3, %v60_v11  ;;  %v69_v26 = vrot.slane %v516_v22, 7  ;;  %v547_v47 = vld [vmem:[#allocation2 + $0x58] sm:$0xff]  ;;  %v552_v52 = vld [vmem:[#allocation2 + $0x60] sm:$0xff]  ;;  %v562_v60 = vld [vmem:[#allocation2 + $0x68] sm:$0xff]  ;;  %s448_s25 = smov [#allocation5]  }
  0x19   :  { %187 = vrot.lane.b32.xlu1 %v487_v4, %s446_s23  ;;  %183 = vrot.lane.b32.xlu0 %v492_v7, %s446_s23  ;;  %v117_v17 = vmul.f32 %v101_v9, %v101_v9  ;;  %v115_v18 = vmul.f32 %v99_v10, %v99_v10  ;;  %v102_v21 = vsub.f32 %v487_v4, %v64_v13  ;;  %v71_v31 = vrot.slane %v521_v27, 7  ;;  %v567_v3 = vld [vmem:[#allocation2 + $0x70] sm:$0xff]  ;;  %v571_v10 = vld [vmem:[#allocation2 + $0x78] sm:$0xff]  ;;  %s337_s26 = sshll.u32 %s448_s25, 4  ;;  %s338_s26 = int_to_ptr.vmem [resolvable:$true] %s337_s26 }
  0x1a   :  { %v100_v23 = vsub.f32 %v492_v7, %v61_v19  ;;  %v67_v24 = vsel %vm58_vm0, %v65_v8, %v66_v14  ;;  %v119_v25 = vmul.f32 %v103_v15, %v103_v15  ;;  %v105_v30 = vsub.f32 %v507_v16, %v68_v20  ;;  %s393_s27 = scalar_lea.vmem %s338_s26, 16  ;;  %s397_s28 = scalar_lea.vmem %s338_s26, 32 }
  0x1b   :  { %v133_v28 = vsel %vm131_vm1, %v117_v17, 0.0  ;;  %v132_v29 = vsel %vm131_vm1, %v115_v18, 0.0  ;;  %vm147_vm2 = vcmask 130048   ;;  %v118_v32 = vmul.f32 %v102_v21, %v102_v21  ;;  %p394_p8 = scmp.ne.s32.totalorder %s338_s26, %s393_s27  ;;  %p398_p9 = scmp.lt.s32.totalorder %s338_s26, %s338_s26 }
  0x1c   :  { %v104_v33 = vsub.f32 %v502_v12, %v67_v24  ;;  %v134_v35 = vadd.f32 %v133_v28, %v132_v29  ;;  %v116_v36 = vmul.f32 %v100_v23, %v100_v23  ;;  %v70_v37 = vsel %vm58_vm0, %v68_v20, %v69_v26  ;;  %p399_p10 = scmp.lt.s32.totalorder %s397_s28, %s393_s27 }
  0x1d   :  { %191 = vrot.lane.b32.xlu1 %v502_v12, %s446_s23  ;;  %189 = vrot.lane.b32.xlu0 %v489_v5, %s446_s23  ;;  %v72_v38 = vrot.slane %v532_v34, 7  ;;  %v135_v40 = vsel %vm131_vm1, %v119_v25, 0.0  ;;  %v121_v41 = vmul.f32 %v105_v30, %v105_v30  ;;  %v107_v42 = vsub.f32 %v521_v27, %v71_v31 }
  0x1e   :  { %v74_v43 = vrot.slane %v536_v39, 7  ;;  %v149_v44 = vsel %vm147_vm2, %v118_v32, 0.0  ;;  %v120_v45 = vmul.f32 %v104_v33, %v104_v33  ;;  %v106_v46 = vsub.f32 %v516_v22, %v70_v37  ;;  %p400_p11 = por %p399_p10, %p398_p9 }
  0x1f   :  { %v148_v48 = vsel %vm147_vm2, %v116_v36, 0.0  ;;  %v136_v49 = vadd.f32 %v135_v40, %v134_v35  ;;  %v73_v50 = vsel %vm58_vm0, %v71_v31, %v72_v38  ;;  %v75_v51 = vrot.slane %v547_v47, 7 }
  0x20   :  { %v137_v53 = vsel %vm131_vm1, %v121_v41, 0.0  ;;  %v123_v54 = vmul.f32 %v107_v42, %v107_v42  ;;  %v109_v55 = vsub.f32 %v536_v39, %v74_v43  ;;  %v77_v56 = vrot.slane %v552_v52, 7  ;;  %p401_p12 = pnand %p400_p11, %p394_p8 }
  0x21   :  { %195 = vrot.lane.b32.xlu1 %v516_v22, %s446_s23  ;;  %193 = vrot.lane.b32.xlu0 %v507_v16, %s446_s23  ;;  %v150_v57 = vadd.f32 %v149_v44, %v148_v48  ;;  %v151_v58 = vsel %vm147_vm2, %v120_v45, 0.0  ;;  %v122_v59 = vmul.f32 %v106_v46, %v106_v46  ;;  %v138_v61 = vadd.f32 %v137_v53, %v136_v49 }
  0x22   :  { %v108_v62 = vsub.f32 %v532_v34, %v73_v50  ;;  %v76_v63 = vsel %vm58_vm0, %v74_v43, %v75_v51  ;;  %v78_v2 = vrot.slane %v562_v60, 7  ;;  %v139_v6 = vsel %vm131_vm1, %v123_v54, 0.0 }
  0x23   :  { %v125_v8 = vmul.f32 %v109_v55, %v109_v55  ;;  %v111_v9 = vsub.f32 %v552_v52, %v77_v56  ;;  %v80_v11 = vrot.slane %v567_v3, 7  ;;  %v81_v13 = vrot.slane %v571_v10, 7 }
  0x24   :  { %v152_v14 = vadd.f32 %v151_v58, %v150_v57  ;;  %v153_v15 = vsel %vm147_vm2, %v122_v59, 0.0  ;;  %v124_v17 = vmul.f32 %v108_v62, %v108_v62  ;;  %v140_v18 = vadd.f32 %v139_v6, %v138_v61 }
  0x25   :  { %199 = vrot.lane.b32.xlu1 %v532_v34, %s446_s23  ;;  %197 = vrot.lane.b32.xlu0 %v521_v27, %s446_s23  ;;  %v110_v19 = vsub.f32 %v547_v47, %v76_v63  ;;  %v141_v20 = vsel %vm131_vm1, %v125_v8, 0.0  ;;  %v79_v21 = vsel %vm58_vm0, %v77_v56, %v78_v2  ;;  %v127_v23 = vmul.f32 %v111_v9, %v111_v9 }
  0x26   :  { %v113_v24 = vsub.f32 %v567_v3, %v80_v11  ;;  %v82_v25 = vsel %vm58_vm0, %v80_v11, %v81_v13  ;;  %v154_v26 = vadd.f32 %v153_v15, %v152_v14  ;;  %v155_v28 = vsel %vm147_vm2, %v124_v17, 0.0 }
  0x27   :  { %v142_v29 = vadd.f32 %v141_v20, %v140_v18  ;;  %v112_v30 = vsub.f32 %v562_v60, %v79_v21  ;;  %v126_v31 = vmul.f32 %v110_v19, %v110_v19  ;;  %v143_v32 = vsel %vm131_vm1, %v127_v23, 0.0 }
  0x28   :  { %v114_v33 = vsub.f32 %v571_v10, %v82_v25  ;;  %v129_v35 = vmul.f32 %v113_v24, %v113_v24  ;;  %v156_v36 = vadd.f32 %v155_v28, %v154_v26  ;;  %vm165_vm3 = vcmask 1046528  }
  0x29   :  { %203 = vrot.lane.b32.xlu1 %v547_v47, %s446_s23  ;;  %201 = vrot.lane.b32.xlu0 %v536_v39, %s446_s23  ;;  %v128_v37 = vmul.f32 %v112_v30, %v112_v30  ;;  %v144_v38 = vadd.f32 %v143_v32, %v142_v29  ;;  %v157_v40 = vsel %vm147_vm2, %v126_v31, 0.0  ;;  %vm172_vm4 = vcmask 129024  }
  0x2a   :  { %v130_v41 = vmul.f32 %v114_v33, %v114_v33  ;;  %v145_v42 = vsel %vm131_vm1, %v129_v35, 0.0  ;;  %v158_v44 = vadd.f32 %v157_v40, %v156_v36  ;;  %vm301_vm5 = vcmask 122880  }
  0x2b   :  { %v146_v43 = vadd.f32 %v145_v42, %v144_v38  ;;  %v159_v45 = vsel %vm147_vm2, %v128_v37, 0.0  ;;  %vm261_vm6 = vcmask 130056   ;;  %vm316_vm7 = vcmask 114688  }
  0x2c   :  { %v161_v46 = vsel %vm147_vm2, %v130_v41, 0.0  ;;  %v160_v48 = vadd.f32 %v159_v45, %v158_v44 }
  0x2d   :  { %207 = vrot.lane.b32.xlu1 %v562_v60, %s446_s23  ;;  %205 = vrot.lane.b32.xlu0 %v552_v52, %s446_s23  ;;  %v166_v49 = vrot.slane %v146_v43, 1 }
  0x2e   :  { %v162_v50 = vadd.f32 %v161_v46, %v160_v48 }
  0x30   :  { %v167_v51 = vrot.slane %v162_v50, 1 }
  0x31   :  { %211 = vrot.lane.b32.xlu1 %v571_v10, %s446_s23  ;;  %209 = vrot.lane.b32.xlu0 %v567_v3, %s446_s23 }
  0x32   :  { %v168_v53 = vsel %vm165_vm3, %v166_v49, %v167_v51  ;;  %v173_v54 = vsel %vm172_vm4, %v167_v51, 0.0 }
  0x33   :  { %v171_v55 = vsel %vm147_vm2, %v168_v53, 0.0 }
  0x34   :  { %v174_v56 = vadd.f32 %v173_v54, %v171_v55 }
  0x36   :  { %v175_v57 = vrot.slane %v174_v56, 4 }
  0x38   :  { %v176_v58 = vadd.f32 %v175_v57, %v174_v56 }
  0x3a   :  { %v177_v59 = vrot.slane %v176_v58, 2 }
  0x3c   :  { %v178_v61 = vadd.f32 %v177_v59, %v176_v58 }
  0x3e   :  { %v179_v62 = vrot.slane %v178_v61, 1 }
  0x40   :  { %v180_v63 = vadd.f32 %v179_v62, %v178_v61 }
  0x42   :  { %v302_v2 = vsel %vm301_vm5, %v180_v63, 0.0 }
  0x55   :  { %303 = vadd.xlane.f32.xlu1 %v302_v2 }
  0x87   :  { %v186_v6 = vpop.permute.xlu1 %185  ;;  %v182_v8 = vpop.permute.xlu0 %181 }
  0x88   :  { %v231_v15 = vsub.f32 %v477_v0, %v186_v6  ;;  %v229_v17 = vsub.f32 %v479_v1, %v182_v8 }
  0x8a   :  { %v247_v25 = vmul.f32 %v231_v15, %v231_v15  ;;  %v245_v26 = vmul.f32 %v229_v17, %v229_v17 }
  0x8b   :  { %v188_v9 = vpop.permute.xlu1 %187  ;;  %v184_v11 = vpop.permute.xlu0 %183 }
  0x8c   :  { %v232_v18 = vsub.f32 %v487_v4, %v188_v9  ;;  %v230_v19 = vsub.f32 %v492_v7, %v184_v11  ;;  %v262_v33 = vsel %vm261_vm6, %v245_v26, 0.0 }
  0x8e   :  { %v248_v28 = vmul.f32 %v232_v18, %v232_v18  ;;  %v246_v29 = vmul.f32 %v230_v19, %v230_v19 }
  0x8f   :  { %v192_v13 = vpop.permute.xlu1 %191  ;;  %v190_v14 = vpop.permute.xlu0 %189 }
  0x90   :  { %v234_v20 = vsub.f32 %v502_v12, %v192_v13  ;;  %v233_v21 = vsub.f32 %v489_v5, %v190_v14  ;;  %v263_v5 = vsel %vm261_vm6, %v247_v25, 0.0  ;;  %v278_v35 = vsel %vm261_vm6, %v248_v28, 0.0 }
  0x91   :  { %v277_v36 = vsel %vm261_vm6, %v246_v29, 0.0  ;;  %v264_v44 = vadd.f32 %v263_v5, %v262_v33 }
  0x92   :  { %v250_v1 = vmul.f32 %v234_v20, %v234_v20  ;;  %v249_v31 = vmul.f32 %v233_v21, %v233_v21  ;;  %v279_v45 = vadd.f32 %v278_v35, %v277_v36 }
  0x93   :  { %v196_v23 = vpop.permute.xlu1 %195  ;;  %v194_v24 = vpop.permute.xlu0 %193 }
  0x94   :  { %v236_v30 = vsub.f32 %v516_v22, %v196_v23  ;;  %v235_v0 = vsub.f32 %v507_v16, %v194_v24  ;;  %v280_v16 = vsel %vm261_vm6, %v250_v1, 0.0  ;;  %v265_v38 = vsel %vm261_vm6, %v249_v31, 0.0 }
  0x95   :  { %v281_v51 = vadd.f32 %v280_v16, %v279_v45  ;;  %v266_v53 = vadd.f32 %v265_v38, %v264_v44 }
  0x96   :  { %v252_v37 = vmul.f32 %v236_v30, %v236_v30  ;;  %v251_v22 = vmul.f32 %v235_v0, %v235_v0 }
  0x97   :  { %v200_v4 = vpop.permute.xlu1 %199  ;;  %v198_v32 = vpop.permute.xlu0 %197 }
  0x98   :  { %v238_v7 = vsub.f32 %v532_v34, %v200_v4  ;;  %v237_v12 = vsub.f32 %v521_v27, %v198_v32  ;;  %v282_v46 = vsel %vm261_vm6, %v252_v37, 0.0  ;;  %v267_v48 = vsel %vm261_vm6, %v251_v22, 0.0 }
  0x99   :  { %v283_v58 = vadd.f32 %v282_v46, %v281_v51  ;;  %v268_v59 = vadd.f32 %v267_v48, %v266_v53 }
  0x9a   :  { %v254_v42 = vmul.f32 %v238_v7, %v238_v7  ;;  %v253_v34 = vmul.f32 %v237_v12, %v237_v12 }
  0x9b   :  { %v204_v40 = vpop.permute.xlu1 %203  ;;  %v202_v41 = vpop.permute.xlu0 %201 }
  0x9c   :  { %v240_v27 = vsub.f32 %v547_v47, %v204_v40  ;;  %v239_v43 = vsub.f32 %v536_v39, %v202_v41  ;;  %v284_v56 = vsel %vm261_vm6, %v254_v42, 0.0  ;;  %v269_v57 = vsel %vm261_vm6, %v253_v34, 0.0 }
  0x9d   :  { %v285_v6 = vadd.f32 %v284_v56, %v283_v58  ;;  %v270_v8 = vadd.f32 %v269_v57, %v268_v59 }
  0x9e   :  { %v256_v49 = vmul.f32 %v240_v27, %v240_v27  ;;  %v255_v50 = vmul.f32 %v239_v43, %v239_v43 }
  0x9f   :  { %v208_v54 = vpop.permute.xlu1 %207  ;;  %v206_v55 = vpop.permute.xlu0 %205 }
  0xa0   :  { %v242_v47 = vsub.f32 %v562_v60, %v208_v54  ;;  %v241_v39 = vsub.f32 %v552_v52, %v206_v55  ;;  %v286_v61 = vsel %vm261_vm6, %v256_v49, 0.0  ;;  %v271_v62 = vsel %vm261_vm6, %v255_v50, 0.0 }
  0xa1   :  { %v287_v15 = vadd.f32 %v286_v61, %v285_v6  ;;  %v272_v17 = vadd.f32 %v271_v62, %v270_v8 }
  0xa2   :  { %v258_v63 = vmul.f32 %v242_v47, %v242_v47  ;;  %v257_v2 = vmul.f32 %v241_v39, %v241_v39 }
  0xa3   :  { %v212_v9 = vpop.permute.xlu1 %211  ;;  %v210_v11 = vpop.permute.xlu0 %209 }
  0xa4   :  { %v288_v13 = vsel %vm261_vm6, %v258_v63, 0.0  ;;  %v273_v14 = vsel %vm261_vm6, %v257_v2, 0.0  ;;  %v244_v60 = vsub.f32 %v571_v10, %v212_v9  ;;  %v243_v52 = vsub.f32 %v567_v3, %v210_v11 }
  0xa5   :  { %v289_v20 = vadd.f32 %v288_v13, %v287_v15  ;;  %v274_v21 = vadd.f32 %v273_v14, %v272_v17 }
  0xa6   :  { %v260_v18 = vmul.f32 %v244_v60, %v244_v60  ;;  %v259_v19 = vmul.f32 %v243_v52, %v243_v52 }
  0xa8   :  { %v290_v23 = vsel %vm261_vm6, %v260_v18, 0.0  ;;  %v275_v24 = vsel %vm261_vm6, %v259_v19, 0.0 }
  0xa9   :  { %v291_v25 = vadd.f32 %v290_v23, %v289_v20  ;;  %v276_v26 = vadd.f32 %v275_v24, %v274_v21 }
  0xab   :  { %v293_v28 = vsel %vm261_vm6, %v291_v25, 0.0  ;;  %v292_v29 = vsel %vm261_vm6, %v276_v26, 0.0 }
  0xac   :  { %v294_v30 = vadd.f32 %v293_v28, %v292_v29 }
  0xae   :  { %v295_v10 = vrot.slane %v294_v30, 4 }
  0xb0   :  { %v296_v0 = vadd.f32 %v295_v10, %v294_v30 }
  0xb2   :  { %v297_v3 = vrot.slane %v296_v0, 2 }
  0xb4   :  { %v298_v1 = vadd.f32 %v297_v3, %v296_v0 }
  0xb6   :  { %v299_v31 = vrot.slane %v298_v1, 1 }
  0xb8   :  { %v300_v4 = vadd.f32 %v299_v31, %v298_v1 }
  0xba   :  { %313 = vrot.lane.b32.xlu0 %v300_v4, %s447_s0 }
  0xe2   :  { %v304_v12 = vpop.xlane.xlu1 %303 }
  0xe3   :  { %v305_v5 = vrot.slane %v304_v12, 4 }
  0xe5   :  { %v306_v33 = vadd.f32 %v305_v5, %v304_v12 }
  0xe7   :  { %v307_v35 = vrot.slane %v306_v33, 2 }
  0xe9   :  { %v308_v36 = vadd.f32 %v307_v35, %v306_v33 }
  0xeb   :  { %v309_v37 = vrot.slane %v308_v36, 1 }
  0xed   :  { %v310_v22 = vadd.f32 %v309_v37, %v308_v36 }
  0xef   :  { %360 = vpush %v310_v22 }
 0x120   :  { %s361_s24 = spop %360 }
 0x121   :  { %v327_v16 = vstv %s361_s24 }
 0x122   :  { %328 = vst [vmem:[#allocation5] sm:$0x1] %v327_v16 }
 0x12c   :  { %v314_v32 = vpop.permute.xlu0 %313 }
 0x12d   :  { %v317_v7 = vsel %vm316_vm7, %v314_v32, 0.0 }
 0x12e   :  { %318 = vadd.xlane.f32.xlu0 %v317_v7 }
 0x12f   :  { %404 = shalt.err (!%p401_p12)
}
 0x130   :  { %s405_s3 = scalar_lea.hbm %s657_s1, 16 }
 0x131   :  { %p406_p13 = scmp.ne.s32.totalorder %s657_s1, %s405_s3  ;;  %p409_p0 = scmp.lt.u32.totalorder %s405_s3, %s657_s1 }
 0x133   :  { %p411_p1 = pnand %p409_p0, %p406_p13 }
 0x135   :  { %414 = shalt.err (!%p411_p1)
}
 0x136   :  { %340 = dma.vmem_to_hbm [thread:$0]  %s338_s26, 16, %s657_s1, [#allocation4]  }
 0x137   :  { %s449_s10 = smov [#allocation6]  }
 0x138   :  { %s347_s11 = sshll.u32 %s449_s10, 4  ;;  %s348_s11 = int_to_ptr.vmem [resolvable:$true] %s347_s11 }
 0x139   :  { %s415_s13 = scalar_lea.vmem %s348_s11, 16  ;;  %s419_s14 = scalar_lea.vmem %s348_s11, 32 }
 0x13a   :  { %p416_p2 = scmp.ne.s32.totalorder %s348_s11, %s415_s13  ;;  %p420_p3 = scmp.lt.s32.totalorder %s348_s11, %s348_s11 }
 0x13b   :  { %p421_p4 = scmp.lt.s32.totalorder %s419_s14, %s415_s13 }
 0x13d   :  { %p422_p5 = por %p421_p4, %p420_p3 }
 0x13f   :  { %p423_p6 = pnand %p422_p5, %p416_p2 }
 0x1bb   :  { %v319_v38 = vpop.xlane.xlu0 %318 }
 0x1bc   :  { %v320_v40 = vrot.slane %v319_v38, 4 }
 0x1be   :  { %v321_v41 = vadd.f32 %v320_v40, %v319_v38 }
 0x1c0   :  { %v322_v42 = vrot.slane %v321_v41, 2 }
 0x1c2   :  { %v323_v34 = vadd.f32 %v322_v42, %v321_v41 }
 0x1c4   :  { %v324_v27 = vrot.slane %v323_v34, 1 }
 0x1c6   :  { %v325_v43 = vadd.f32 %v324_v27, %v323_v34 }
 0x1c8   :  { %362 = vpush %v325_v43 }
 0x1f9   :  { %s363_s12 = spop %362 }
 0x1fa   :  { %v329_v44 = vstv %s363_s12 }
 0x1fb   :  { %330 = vst [vmem:[#allocation6] sm:$0x1] %v329_v44 }
 0x1fc   :  { %426 = shalt.err (!%p423_p6)
}
 0x1fd   :  { %s427_s16 = scalar_lea.hbm %s658_s2, 16 }
 0x1fe   :  { %p428_p7 = scmp.ne.s32.totalorder %s658_s2, %s427_s16  ;;  %p431_p8 = scmp.lt.u32.totalorder %s427_s16, %s658_s2 }
 0x200   :  { %p433_p9 = pnand %p431_p8, %p428_p7 }
 0x202   :  { %436 = shalt.err (!%p433_p9)
}
 0x203   :  { %350 = dma.vmem_to_hbm [thread:$0]  %s348_s11, 16, %s658_s2, [#allocation7]  }
 0x204   :  { %439 = dma.done.wait [#allocation4], 16  }
 0x205   :  { %440 = vsyncadd [#allocation4], 4294967280 }
 0x206   :  { %441 = dma.done.wait [#allocation7], 16  }
 0x207   :  { %442 = vsyncadd [#allocation7], 4294967280 }
 0x208   :  { %357 = vsyncpa [#allocation3], 1 }
 0x209   :  { %358 = vsyncpa [#allocation4], 1 }
 0x20a   :  { %359 = vsyncpa [#allocation7], 1 }

</bundles_post_ra>
